<compile_context>
chip_gen: v7x
topology: tpu7x:2x2x1
jax: 0.10.0
libtpu: 0.0.40
codegen_flags: <defaults>
</compile_context>

<pallas_src>
import functools

import jax
import jax.numpy as jnp
from jax.experimental import pallas as pl
from jax.experimental.pallas import tpu as pltpu

_LANES = 128
_ACC_ROWS = 8                      # f32 sublanes per vreg (accumulator rows)
_WHOLE_BLOCK_BYTES = 512 * 1024    # single-block bypass threshold


def _default_block_bytes():
    """Per-block (f32 working set) budget: bigger tiles on v6e/v7x, 4 MiB on older."""
    try:
        kind = jax.devices()[0].device_kind.lower()
    except Exception:  # pragma: no cover - defensive
        kind = ""
    for old in ("v2", "v3", "v4", "v5"):
        if old in kind:
            return 4 * 1024 * 1024     # ~822-900 GB/s HBM: 4 MiB already >90% roofline
    return 8 * 1024 * 1024             # v6e/v7x: cut per-step overhead below ~10%


def _gp_sumsq_tiled_kernel(g_ref, out_ref, acc_ref, *, rows_tile):
    """grid = (n_split, batch, row_tiles); reduction axis last.

    g_ref:   (1, rows_tile, 128)  gradient block (rows fill sublanes)
    out_ref: (1, 1, 1, 128)       lane partial sums for this (split, sample)
    acc_ref: (1, 8, 128)          vreg-sized f32 accumulator
    """
    k = pl.program_id(2)

    @pl.when(k == 0)
    def _():
        acc_ref[...] = jnp.zeros_like(acc_ref)

    # Square and fold the block into a single vreg-shaped accumulator.
    # Major-axis reduce == a chain of whole-vreg VALU adds (no XLU), and the
    # per-vreg acc read-modify-write of the old version is gone.
    g = g_ref[...].astype(jnp.float32).reshape(
        rows_tile // _ACC_ROWS, _ACC_ROWS, _LANES)
    acc_ref[...] += jnp.sum(g * g, axis=0, keepdims=True)

    @pl.when(k == pl.num_programs(2) - 1)
    def _():
        # One tiny 8-sublane reduce per (split, sample), off the hot loop.
        out_ref[...] = jnp.sum(acc_ref[...], axis=1, keepdims=True).reshape(
            out_ref.shape)


def _gp_sumsq_whole_kernel(g_ref, out_ref):
    """Tiny-problem path: one block covering the whole (B, R, 128) array."""
    g = g_ref[...].astype(jnp.float32)
    out_ref[...] = jnp.sum(g * g, axis=1, keepdims=True)   # (B, 1, 128)


def gp_penalty_from_gradients(gradients, *, target_block_bytes=None,
                              force_tiled=False):
    """Pallas hot path: ((||grad||_2 - 1)^2).mean() over flattened per-sample grads."""
    B = gradients.shape[0]
    g_flat = gradients.reshape(B, -1)              # same as torch .view(B, -1)
    D = g_flat.shape[1]
    itemsize = jnp.dtype(g_flat.dtype).itemsize
    if target_block_bytes is None:
        target_block_bytes = _default_block_bytes()

    # Dtype-aware row granularity for the input block (f32:8, bf16:16, int8/fp8:32).
    sub = max(_ACC_ROWS, 32 // max(1, itemsize))

    r_raw = pl.cdiv(D, _LANES)                     # rows of 128 lanes per sample
    total_bytes = B * r_raw * _LANES * itemsize
    use_grid = force_tiled or total_bytes > _WHOLE_BLOCK_BYTES

    if not use_grid:
        # Small problem: one block, no grid -> no per-step overhead.
        D_pad = r_raw * _LANES
        if D_pad != D:
            g_flat = jnp.pad(g_flat, ((0, 0), (0, D_pad - D)))   # tiny; exact for sum-sq
        g3 = g_flat.reshape(B, r_raw, _LANES)
        partial = pl.pallas_call(
            _gp_sumsq_whole_kernel,
            out_shape=jax.ShapeDtypeStruct((B, 1, _LANES), jnp.float32),
            in_specs=[pl.BlockSpec(memory_space=pltpu.MemorySpace.VMEM)],
            out_specs=pl.BlockSpec(memory_space=pltpu.MemorySpace.VMEM),
        )(g3)
        sumsq = jnp.sum(partial[:, 0, :], axis=-1)                # (B,)
    else:
        # Rows per block, budgeted against the f32 working set (kernel accumulates f32).
        rows_cap = max(sub, (target_block_bytes // (_LANES * 4)) // sub * sub)
        n_tiles = max(1, pl.cdiv(r_raw, rows_cap))
        if n_tiles == 1 and r_raw >= 2 * sub:
            n_tiles = 2            # >=2 tiles so the per-tile reduce hides under DMA
        # Odd batch (incl. B==1): split the reduction 2-way so both v7x
        # TensorCores get a parallel axis to shard; harmless on 1-TC chips.
        n_split = 2 if (B % 2 == 1 and n_tiles >= 2) else 1
        tiles_per_split = pl.cdiv(n_tiles, n_split)
        n_tiles = n_split * tiles_per_split
        rows_tile = pl.cdiv(pl.cdiv(r_raw, n_tiles), sub) * sub
        R = n_tiles * rows_tile
        D_pad = R * _LANES
        if D_pad != D:
            # TODO(synk): mask the ragged tail inside the last tile
            # (broadcasted_iota vs D, jnp.where before squaring) instead of
            # materializing a padded HBM copy of the whole gradient tensor.
            g_flat = jnp.pad(g_flat, ((0, 0), (0, D_pad - D)))
        g3 = g_flat.reshape(B, R, _LANES)

        block_bytes = rows_tile * _LANES * 4       # f32 working set per block
        vmem_limit = int(max(32 * 2**20, min(56 * 2**20, 4 * block_bytes + 8 * 2**20)))
        cost = pl.CostEstimate(
            flops=2 * B * R * _LANES,
            bytes_accessed=B * R * _LANES * itemsize + n_split * B * _LANES * 4,
            transcendentals=0)

        kernel = functools.partial(_gp_sumsq_tiled_kernel, rows_tile=rows_tile)
        partial = pl.pallas_call(
            kernel,
            out_shape=jax.ShapeDtypeStruct((n_split, B, 1, _LANES), jnp.float32),
            grid_spec=pltpu.PrefetchScalarGridSpec(
                num_scalar_prefetch=0,
                grid=(n_split, B, tiles_per_split),         # reduction axis last
                in_specs=[pl.BlockSpec(
                    (1, rows_tile, _LANES),
                    lambda s, b, k: (b, s * tiles_per_split + k, 0))],
                out_specs=pl.BlockSpec((1, 1, 1, _LANES),
                                       lambda s, b, k: (s, b, 0, 0)),
                scratch_shapes=[pltpu.VMEM((1, _ACC_ROWS, _LANES), jnp.float32)],
            ),
            compiler_params=pltpu.CompilerParams(
                dimension_semantics=("parallel", "parallel", "arbitrary"),
                vmem_limit_bytes=vmem_limit,
            ),
            cost_estimate=cost,
        )(g3)
        sumsq = jnp.sum(partial, axis=(0, 2, 3))                  # (B,)

    norm = jnp.sqrt(sumsq)
    return jnp.mean((norm - 1.0) ** 2)


def gp_loss(disc_fn, x):
    """Full GPLoss.forward equivalent (y must be recomputed from x here)."""
    # grad_outputs=ones(B,1) equivalence requires per-sample scalar logits.
    y_sd = jax.eval_shape(disc_fn, x)
    assert (y_sd.shape[0] == x.shape[0]
            and (len(y_sd.shape) == 1 or (len(y_sd.shape) == 2 and y_sd.shape[1] == 1))), (
        "disc_fn must return per-sample scalar logits of shape (B,) or (B, 1)")
    # TODO(synk): torch.autograd.grad on a prebuilt (y, x) graph has no Pallas
    # analog; the VJP is taken with jax.grad.  Fusing the square-and-accumulate
    # into the discriminator's VJP (custom_vjp) would remove the extra full
    # gradient HBM pass entirely -- bigger win than any tuning of this kernel.
    grads = jax.grad(lambda xx: jnp.sum(disc_fn(xx)))(x)   # same shape as x (NCHW)
    return gp_penalty_from_gradients(grads)


# ---- small deterministic "discriminator" so gradients are nontrivial -------
def make_disc(key, in_features):
    k1, k2 = jax.random.split(key)
    w1 = jax.random.normal(k1, (in_features, 1), jnp.float32) * 0.02
    w2 = jax.random.normal(k2, (in_features, 1), jnp.float32) * 0.02

    def disc(x_nchw):                                # x: (B, C, H, W) -> y: (B, 1)
        xf = x_nchw.reshape(x_nchw.shape[0], -1)
        return xf @ w1 + (xf * xf) @ w2
    return disc


def _ref_penalty(grads):
    b = grads.shape[0]
    norms = jnp.linalg.norm(grads.reshape(b, -1).astype(jnp.float32), axis=1)
    return jnp.mean((norms - 1.0) ** 2)


if __name__ == "__main__":
    key = jax.random.PRNGKey(0)
    kx, kd, k1, k2, k3, k4, k5 = jax.random.split(key, 7)

    # Module-consistent shapes: x = interpolated images (NCHW).
    B, C, H, W = 2, 4, 16, 16
    x = jax.random.normal(kx, (B, C, H, W), jnp.float32)
    disc = make_disc(kd, C * H * W)

    loss = jax.block_until_ready(jax.jit(lambda xx: gp_loss(disc, xx))(x))
    grads_ref = jax.grad(lambda xx: jnp.sum(disc(xx)))(x)
    loss_ref = _ref_penalty(grads_ref)
    assert jnp.allclose(loss, loss_ref, rtol=1e-5, atol=1e-5), (loss, loss_ref)

    # Grid path with small forced tiles (even batch, n_split == 1).
    g_big = jax.random.normal(k1, (2, 4, 32, 32), jnp.float32)
    got_big = jax.block_until_ready(
        jax.jit(functools.partial(gp_penalty_from_gradients,
                                  target_block_bytes=4096,
                                  force_tiled=True))(g_big))
    assert jnp.allclose(got_big, _ref_penalty(g_big), rtol=1e-5, atol=1e-5)

    # Ragged path: D = 3*28*28 is not a multiple of 128 (padded tail).
    g_odd = jax.random.normal(k2, (2, 3, 28, 28), jnp.float32)
    got_odd = jax.block_until_ready(
        jax.jit(functools.partial(gp_penalty_from_gradients,
                                  target_block_bytes=4096,
                                  force_tiled=True))(g_odd))
    assert jnp.allclose(got_odd, _ref_penalty(g_odd), rtol=1e-5, atol=1e-5)

    # Odd batch (B=1) -> 2-way reduction split (keeps both v7x cores busy).
    g_b1 = jax.random.normal(k3, (1, 4, 32, 32), jnp.float32)
    got_b1 = jax.block_until_ready(
        jax.jit(functools.partial(gp_penalty_from_gradients,
                                  target_block_bytes=4096,
                                  force_tiled=True))(g_b1))
    assert jnp.allclose(got_b1, _ref_penalty(g_b1), rtol=1e-5, atol=1e-5)

    # Default tiled path (auto block size, >=2 tiles, no padding).
    g_mid = jax.random.normal(k4, (2, 32, 64, 64), jnp.float32)
    got_mid = jax.block_until_ready(jax.jit(gp_penalty_from_gradients)(g_mid))
    assert jnp.allclose(got_mid, _ref_penalty(g_mid), rtol=1e-4, atol=1e-4)

    # bf16 gradients: exercises the 16-row (sub-32-bit packing) tile rounding.
    g_bf = jax.random.normal(k5, (2, 4, 32, 32), jnp.bfloat16)
    got_bf = jax.block_until_ready(
        jax.jit(functools.partial(gp_penalty_from_gradients,
                                  target_block_bytes=8192,
                                  force_tiled=True))(g_bf))
    assert jnp.allclose(got_bf, _ref_penalty(g_bf), rtol=1e-4, atol=1e-4)

    print("KERNEL_OK")
</pallas_src>

<mosaic_0001>
module attributes {stable_mosaic.version = 11 : i64} {
  func.func @_gp_sumsq_whole_kernel(%arg0: memref<2x8x128xf32, #tpu.memory_space<vmem>>, %arg1: memref<2x1x128xf32, #tpu.memory_space<vmem>>) attributes {dimension_semantics = [], scalar_prefetch = 0 : i64, scratch_operands = 0 : i64, tpu.core_type = #tpu.core_type<tc>} {
    %c0 = arith.constant 0 : index
    %c0_0 = arith.constant 0 : index
    %c0_1 = arith.constant 0 : index
    %0 = vector.load %arg0[%c0, %c0_0, %c0_1] : memref<2x8x128xf32, #tpu.memory_space<vmem>>, vector<2x8x128xf32>
    %1 = arith.mulf %0, %0 : vector<2x8x128xf32>
    %cst = arith.constant dense<0.000000e+00> : vector<2x128xf32>
    %2 = vector.multi_reduction <add>, %1, %cst [1] : vector<2x8x128xf32> to vector<2x128xf32>
    %3 = vector.shape_cast %2 : vector<2x128xf32> to vector<2x1x128xf32>
    %c0_2 = arith.constant 0 : index
    %c0_3 = arith.constant 0 : index
    %c0_4 = arith.constant 0 : index
    %4 = vector.load %arg1[%c0_2, %c0_3, %c0_4] : memref<2x1x128xf32, #tpu.memory_space<vmem>>, vector<2x1x128xf32>
    tpu.vector_store %arg1[%c0_2, %c0_3, %c0_4], %3 {strides = array<i32>} : memref<2x1x128xf32, #tpu.memory_space<vmem>>, vector<2x1x128xf32>,
    return
  }
}

</mosaic_0001>

<bundles_post_ra>
// kernel: _lambda_.1
= control target key start
LH: loop header
LB: loop body
LE: loop exit
PB: predicated region body
PF: predicated region fallthrough
CT: control target
= control target key end

     0   :  { %s52_s0 = inlined_call_operand.vmem [shape: f32[2,8,128], index: 0, kind: input, shape index: {}]   ;;  %s53_s1 = inlined_call_operand.vmem [shape: f32[2,1,128], index: 1, kind: output, shape index: {}]  }
   0x1   :  { %v8_v0 = vld [vmem:[%s52_s0] sm:$0xff]  ;;  %v9_v1 = vld [vmem:[%s52_s0 + $0x8] sm:$0xff] }
   0x2   :  { %v10_v2 = vmul.f32 %v8_v0, %v8_v0  ;;  %v11_v3 = vmul.f32 %v9_v1, %v9_v1 }
   0x4   :  { %v12_v4 = vrot.slane %v10_v2, 4  ;;  %v18_v5 = vrot.slane %v11_v3, 4 }
   0x6   :  { %v13_v6 = vadd.f32 %v12_v4, %v10_v2  ;;  %v19_v7 = vadd.f32 %v18_v5, %v11_v3 }
   0x8   :  { %v14_v8 = vrot.slane %v13_v6, 2  ;;  %v20_v9 = vrot.slane %v19_v7, 2 }
   0xa   :  { %v15_v10 = vadd.f32 %v14_v8, %v13_v6  ;;  %v21_v11 = vadd.f32 %v20_v9, %v19_v7 }
   0xc   :  { %v16_v12 = vrot.slane %v15_v10, 1  ;;  %v22_v13 = vrot.slane %v21_v11, 1 }
   0xe   :  { %v17_v14 = vadd.f32 %v16_v12, %v15_v10  ;;  %v23_v15 = vadd.f32 %v22_v13, %v21_v11 }
  0x10   :  { %24 = vst [vmem:[%s53_s1] sm:$0x1] %v17_v14  ;;  %25 = vst [vmem:[%s53_s1 + $0x1] sm:$0x1] %v23_v15 }

</bundles_post_ra>
